<compile_context>
chip_gen: v5e
topology: v5e:2x2
jax: 0.10.0
libtpu: 0.0.40
codegen_flags: <defaults>
</compile_context>

<pallas_src>
import functools

import jax
import jax.numpy as jnp
from jax.experimental import pallas as pl
from jax.experimental.pallas import tpu as pltpu


def _round_up(x: int, m: int) -> int:
    return (x + m - 1) // m * m


def _pick_h_chunk(h_p: int, hint: int) -> int:
    """Largest multiple of 128 <= hint that divides h_p (h_p itself if small)."""
    if h_p <= hint:
        return h_p
    for c in range(hint - hint % 128, 0, -128):
        if c > 0 and h_p % c == 0:
            return c
    return 128


def _vmem_limit_bytes(tm, d_in_p, h_p, d_out_p, h_chunk,
                      x_dtype, out_dtype, compute_dtype):
    """Scoped-VMEM budget: single-buffered weights + double-buffered tiles
    + per-chunk temporaries, with ~50% headroom."""
    wsz = jnp.dtype(compute_dtype).itemsize
    weights = (d_in_p * h_p + h_p * d_out_p) * wsz + (h_p + d_out_p) * 4
    x_tiles = 2 * tm * d_in_p * jnp.dtype(x_dtype).itemsize
    y_tiles = 2 * tm * d_out_p * jnp.dtype(out_dtype).itemsize
    temps = tm * h_chunk * (4 + wsz) + tm * d_out_p * 4   # f32 h slab + recast + acc
    budget = int((weights + x_tiles + y_tiles + temps) * 1.5) + (4 << 20)
    # Floor above the default scoped limits; cap well below physical VMEM.
    return max(32 << 20, min(budget, 100 << 20))


def _two_layer_net_kernel(x_ref, w1_ref, b1_ref, w2_ref, b2_ref, o_ref, *,
                          h_chunk, n_chunks, compute_dtype):
    # Cast the streamed x tile to the MXU compute dtype in-kernel (VPU work,
    # hidden under the matmuls; avoids a separate unhidden HBM cast pass).
    x = x_ref[...].astype(compute_dtype)
    acc = None
    # Static unroll over H slabs: fuse layer-1 matmul + bias + relu + recast
    # with the layer-2 accumulation -> no full (tm, H) f32/bf16 temporary.
    for c in range(n_chunks):
        sl = slice(c * h_chunk, (c + 1) * h_chunk)        # static slice (free)
        h = jnp.dot(x, w1_ref[:, sl], preferred_element_type=jnp.float32)
        h = jnp.maximum(h + b1_ref[:, sl], 0.0)           # f32 bias + relu (VPU)
        part = jnp.dot(h.astype(compute_dtype), w2_ref[sl, :],
                       preferred_element_type=jnp.float32)
        acc = part if acc is None else acc + part
    o_ref[...] = (acc + b2_ref[...]).astype(o_ref.dtype)


def prepare_two_layer_params(w1, b1, w2, b2, *, compute_dtype=jnp.bfloat16):
    """One-time pad (lane-align to 128) + bf16 cast of the parameters.

    Hoisted out of the per-call path so the f32->bf16 weight read/write pass
    is not paid on every forward.  w1: (D_in, H), w2: (H, D_out) -- i.e. the
    torch.nn.Linear weights pre-transposed.  Biases stay f32 (epilogue dtype).
    """
    D_in, H = w1.shape
    H2, D_out = w2.shape
    assert H == H2 and b1.size == H and b2.size == D_out
    d_in_p, h_p, d_out_p = (_round_up(d, 128) for d in (D_in, H, D_out))
    w1p = jnp.zeros((d_in_p, h_p), compute_dtype).at[:D_in, :H].set(
        w1.astype(compute_dtype))
    w2p = jnp.zeros((h_p, d_out_p), compute_dtype).at[:H, :D_out].set(
        w2.astype(compute_dtype))
    b1p = jnp.zeros((1, h_p), jnp.float32).at[0, :H].set(
        b1.reshape(-1).astype(jnp.float32))
    b2p = jnp.zeros((1, d_out_p), jnp.float32).at[0, :D_out].set(
        b2.reshape(-1).astype(jnp.float32))
    return w1p, b1p, w2p, b2p


@functools.partial(jax.jit,
                   static_argnames=("d_out", "block_m", "h_chunk_hint"))
def two_layer_net(x, w1p, b1p, w2p, b2p, *, d_out, block_m=512,
                  h_chunk_hint=512):
    """Forward pass with pre-prepared padded params.

    x: (N, D_in); w1p/b1p/w2p/b2p from prepare_two_layer_params.
    Returns (N, d_out) in x.dtype.
    """
    N, D_in = x.shape
    d_in_p, h_p = w1p.shape
    d_out_p = w2p.shape[1]
    assert d_in_p >= D_in and d_out_p >= d_out
    compute_dtype = w1p.dtype
    out_dtype = x.dtype

    # Batch tile: multiple of 8, <= block_m.  v5e/v6e (128 MiB VMEM): sweep
    # 512/1024; keep 256-512 on v7x (64 MiB per TensorCore).
    tm = min(block_m, _round_up(N, 8))
    n_p = _round_up(N, tm)

    # Only pad x when actually needed (bf16 cast happens inside the kernel).
    if n_p != N or d_in_p != D_in:
        xp = jnp.zeros((n_p, d_in_p), x.dtype).at[:N, :D_in].set(x)
    else:
        xp = x

    h_chunk = _pick_h_chunk(h_p, h_chunk_hint)
    n_chunks = h_p // h_chunk
    vmem_bytes = _vmem_limit_bytes(tm, d_in_p, h_p, d_out_p, h_chunk,
                                   xp.dtype, out_dtype, compute_dtype)

    kernel = functools.partial(_two_layer_net_kernel, h_chunk=h_chunk,
                               n_chunks=n_chunks, compute_dtype=compute_dtype)
    grid = (pl.cdiv(n_p, tm),)
    # TODO(synk): if the resident bf16 weights ever exceed the per-TC VMEM
    # budget (esp. v7x's 64 MiB), switch W1/W2 to memory_space=pl.ANY and
    # stream H slabs with manual DMA inside the chunk loop instead of holding
    # them fully resident.
    y_p = pl.pallas_call(
        kernel,
        out_shape=jax.ShapeDtypeStruct((n_p, d_out_p), out_dtype),
        grid=grid,
        in_specs=[
            # Batch-streamed input tile (double-buffered by the pipeline).
            pl.BlockSpec((tm, d_in_p), lambda i: (i, 0)),
            # Weights & biases: constant block index -> DMA'd once and held
            # VMEM-resident; Buffered(1) single-buffers them.
            pl.BlockSpec((d_in_p, h_p), lambda i: (0, 0),
                         pipeline_mode=pl.Buffered(1)),
            pl.BlockSpec((1, h_p), lambda i: (0, 0),
                         pipeline_mode=pl.Buffered(1)),
            pl.BlockSpec((h_p, d_out_p), lambda i: (0, 0),
                         pipeline_mode=pl.Buffered(1)),
            pl.BlockSpec((1, d_out_p), lambda i: (0, 0),
                         pipeline_mode=pl.Buffered(1)),
        ],
        out_specs=pl.BlockSpec((tm, d_out_p), lambda i: (i, 0)),
        compiler_params=pltpu.CompilerParams(
            dimension_semantics=("parallel",),
            vmem_limit_bytes=vmem_bytes),
    )(xp, w1p, b1p, w2p, b2p)

    if n_p != N or d_out_p != d_out:
        return y_p[:N, :d_out]
    return y_p


if __name__ == "__main__":
    # Small shapes consistent with TwoLayerNet.forward: x is (N, D_in).
    N, D_in, H, D_out = 8, 32, 64, 16

    key = jax.random.PRNGKey(0)
    kx, kw1, kb1, kw2, kb2 = jax.random.split(key, 5)

    x = jax.random.normal(kx, (N, D_in), dtype=jnp.float32)
    # Deterministic synthetic params (nn.Linear-style fan-in scaled uniform),
    # already in (in, out) layout for row-major matmuls.
    bound1 = 1.0 / (D_in ** 0.5)
    w1 = jax.random.uniform(kw1, (D_in, H), jnp.float32, -bound1, bound1)
    b1 = jax.random.uniform(kb1, (H,), jnp.float32, -bound1, bound1)
    bound2 = 1.0 / (H ** 0.5)
    w2 = jax.random.uniform(kw2, (H, D_out), jnp.float32, -bound2, bound2)
    b2 = jax.random.uniform(kb2, (D_out,), jnp.float32, -bound2, bound2)

    # One-time parameter prep (pad + bf16 cast), hoisted out of the call path.
    w1p, b1p, w2p, b2p = prepare_two_layer_params(w1, b1, w2, b2)

    y = two_layer_net(x, w1p, b1p, w2p, b2p, d_out=D_out)
    jax.block_until_ready(y)
    assert y.shape == (N, D_out)

    # Reference 1: mirrors the kernel's bf16-operand / f32-accumulate math.
    xb, w1b, w2b = (a.astype(jnp.bfloat16) for a in (x, w1, w2))
    h_ref = jnp.dot(xb, w1b, preferred_element_type=jnp.float32) + b1
    h_relu_ref = jnp.maximum(h_ref, 0.0)
    y_ref_bf16 = jnp.dot(h_relu_ref.astype(jnp.bfloat16), w2b,
                         preferred_element_type=jnp.float32) + b2
    assert jnp.allclose(y, y_ref_bf16, atol=5e-3, rtol=5e-3)

    # Reference 2: pure-f32 forward semantics of the original module (loose
    # tolerance to cover bf16 operand rounding; error grows with D_in/H).
    y_ref_f32 = jnp.maximum(x @ w1 + b1, 0.0) @ w2 + b2
    assert jnp.allclose(y, y_ref_f32, atol=5e-2, rtol=5e-2)

    print("KERNEL_OK")
</pallas_src>

<mosaic_0001>
module attributes {stable_mosaic.version = 11 : i64} {
  func.func @_two_layer_net_kernel(%arg0: i32, %arg1: memref<8x128xf32, #tpu.memory_space<vmem>>, %arg2: memref<128x128xbf16, #tpu.memory_space<vmem>>, %arg3: memref<1x128xf32, #tpu.memory_space<vmem>>, %arg4: memref<128x128xbf16, #tpu.memory_space<vmem>>, %arg5: memref<1x128xf32, #tpu.memory_space<vmem>>, %arg6: memref<8x128xf32, #tpu.memory_space<vmem>>) attributes {dimension_semantics = [#tpu.dimension_semantics<parallel>], iteration_bounds = array<i64: 1>, scalar_prefetch = 0 : i64, scratch_operands = 0 : i64, tpu.core_type = #tpu.core_type<tc>, window_params = [{transform_indices = @transform_0, window_bounds = array<i64: 8, 128>}, {pipeline_mode = #tpu.pipeline_mode<synchronous>, transform_indices = @transform_1, window_bounds = array<i64: 128, 128>}, {pipeline_mode = #tpu.pipeline_mode<synchronous>, transform_indices = @transform_2, window_bounds = array<i64: 1, 128>}, {pipeline_mode = #tpu.pipeline_mode<synchronous>, transform_indices = @transform_3, window_bounds = array<i64: 128, 128>}, {pipeline_mode = #tpu.pipeline_mode<synchronous>, transform_indices = @transform_4, window_bounds = array<i64: 1, 128>}, {transform_indices = @transform_5, window_bounds = array<i64: 8, 128>}]} {
    %c0 = arith.constant 0 : index
    %c0_0 = arith.constant 0 : index
    %0 = vector.load %arg1[%c0, %c0_0] : memref<8x128xf32, #tpu.memory_space<vmem>>, vector<8x128xf32>
    %1 = arith.truncf %0 : vector<8x128xf32> to vector<8x128xbf16>
    %c0_1 = arith.constant 0 : index
    %c0_2 = arith.constant 0 : index
    %2 = vector.load %arg2[%c0_1, %c0_2] : memref<128x128xbf16, #tpu.memory_space<vmem>>, vector<128x128xbf16>
    %cst = arith.constant dense<0.000000e+00> : vector<8x128xf32>
    %3 = tpu.matmul %1, %2, %cst {dimension_numbers = #tpu.dot_dimension_numbers<[1], [0], [0], [1], [0, 0, 1, 1], [], []>} : vector<8x128xbf16>, vector<128x128xbf16>, vector<8x128xf32> -> vector<8x128xf32>
    %c0_3 = arith.constant 0 : index
    %c0_4 = arith.constant 0 : index
    %4 = vector.load %arg3[%c0_3, %c0_4] : memref<1x128xf32, #tpu.memory_space<vmem>>, vector<1x128xf32>
    %5 = vector.broadcast %4 : vector<1x128xf32> to vector<8x128xf32>
    %6 = arith.addf %3, %5 : vector<8x128xf32>
    %cst_5 = arith.constant 0.000000e+00 : f32
    %7 = vector.broadcast %cst_5 : f32 to vector<8x128xf32>
    %8 = arith.maximumf %6, %7 : vector<8x128xf32>
    %9 = arith.truncf %8 : vector<8x128xf32> to vector<8x128xbf16>
    %c0_6 = arith.constant 0 : index
    %c0_7 = arith.constant 0 : index
    %10 = vector.load %arg4[%c0_6, %c0_7] : memref<128x128xbf16, #tpu.memory_space<vmem>>, vector<128x128xbf16>
    %cst_8 = arith.constant dense<0.000000e+00> : vector<8x128xf32>
    %11 = tpu.matmul %9, %10, %cst_8 {dimension_numbers = #tpu.dot_dimension_numbers<[1], [0], [0], [1], [0, 0, 1, 1], [], []>} : vector<8x128xbf16>, vector<128x128xbf16>, vector<8x128xf32> -> vector<8x128xf32>
    %c0_9 = arith.constant 0 : index
    %c0_10 = arith.constant 0 : index
    %12 = vector.load %arg5[%c0_9, %c0_10] : memref<1x128xf32, #tpu.memory_space<vmem>>, vector<1x128xf32>
    %13 = vector.broadcast %12 : vector<1x128xf32> to vector<8x128xf32>
    %14 = arith.addf %11, %13 : vector<8x128xf32>
    %c0_11 = arith.constant 0 : index
    %c0_12 = arith.constant 0 : index
    %15 = vector.load %arg6[%c0_11, %c0_12] : memref<8x128xf32, #tpu.memory_space<vmem>>, vector<8x128xf32>
    tpu.vector_store %arg6[%c0_11, %c0_12], %14 {strides = array<i32>} : memref<8x128xf32, #tpu.memory_space<vmem>>, vector<8x128xf32>,
    return
  }
  func.func @transform_0(%arg0: i32) -> (i32, i32) {
    %c0_i32 = arith.constant 0 : i32
    %c0_i32_0 = arith.constant 0 : i32
    return %arg0, %c0_i32 : i32, i32
  }
  func.func @transform_1(%arg0: i32) -> (i32, i32) {
    %c0_i32 = arith.constant 0 : i32
    %c0_i32_0 = arith.constant 0 : i32
    %c0_i32_1 = arith.constant 0 : i32
    return %c0_i32, %c0_i32_0 : i32, i32
  }
  func.func @transform_2(%arg0: i32) -> (i32, i32) {
    %c0_i32 = arith.constant 0 : i32
    %c0_i32_0 = arith.constant 0 : i32
    %c0_i32_1 = arith.constant 0 : i32
    return %c0_i32, %c0_i32_0 : i32, i32
  }
  func.func @transform_3(%arg0: i32) -> (i32, i32) {
    %c0_i32 = arith.constant 0 : i32
    %c0_i32_0 = arith.constant 0 : i32
    %c0_i32_1 = arith.constant 0 : i32
    return %c0_i32, %c0_i32_0 : i32, i32
  }
  func.func @transform_4(%arg0: i32) -> (i32, i32) {
    %c0_i32 = arith.constant 0 : i32
    %c0_i32_0 = arith.constant 0 : i32
    %c0_i32_1 = arith.constant 0 : i32
    return %c0_i32, %c0_i32_0 : i32, i32
  }
  func.func @transform_5(%arg0: i32) -> (i32, i32) {
    %c0_i32 = arith.constant 0 : i32
    %c0_i32_0 = arith.constant 0 : i32
    return %arg0, %c0_i32 : i32, i32
  }
}

</mosaic_0001>

<bundles_post_ra>
// kernel: two_layer_net.1
= control target key start
LH: loop header
LB: loop body
LE: loop exit
PB: predicated region body
PF: predicated region fallthrough
CT: control target
= control target key end

     0   :  { %10 = vsyncpa [#allocation3], 0  ;;  %s456_s0 = inlined_call_operand.vmem [shape: f32[8,128], index: 0, kind: input, shape index: {}]   ;;  %s457_s1 = inlined_call_operand.hbm [shape: bf16[128,128], index: 1, kind: input, shape index: {}]   ;;  %s458_s2 = inlined_call_operand.vmem [shape: f32[1,128], index: 2, kind: input, shape index: {}]   ;;  %s459_s3 = inlined_call_operand.hbm [shape: bf16[128,128], index: 3, kind: input, shape index: {}]   ;;  %s460_s4 = inlined_call_operand.vmem [shape: f32[1,128], index: 4, kind: input, shape index: {}]   ;;  %s461_s5 = inlined_call_operand.hbm [shape: f32[8,128], index: 5, kind: output, shape index: {}]  }
   0x1   :  { %11 = vsyncpa [#allocation6], 0 }
   0x2   :  { %12 = vsyncpa [#allocation4], 0  ;;  %s19_s20 = sshll.u32 %s457_s1, 4  ;;  %s403_s21 = smov [#allocation2]   ;;  %s20_s20 = int_to_ptr.hbm [resolvable:$true] %s19_s20 }
   0x3   :  { %s21_s22 = sshll.u32 %s403_s21, 4  ;;  %s34_s25 = sshll.u32 %s459_s3, 4  ;;  %s22_s22 = int_to_ptr.vmem [resolvable:$true] %s21_s22  ;;  %s35_s25 = int_to_ptr.hbm [resolvable:$true] %s34_s25 }
   0x4   :  { %s404_s26 = smov 64   ;;  %s405_s27 = smov 4  }
   0x5   :  { %27 = dma.hbm_to_vmem [thread:$0]  %s20_s20, 1024, %s22_s22, [#allocation3], %s404_s26, %s404_s26, %s405_s27  }
   0x6   :  { %s406_s28 = smov [#allocation5]  }
   0x7   :  { %s36_s29 = sshll.u32 %s406_s28, 4  ;;  %s37_s29 = int_to_ptr.vmem [resolvable:$true] %s36_s29 }
   0x8   :  { %42 = dma.hbm_to_vmem [thread:$0]  %s35_s25, 1024, %s37_s29, [#allocation6], %s404_s26, %s404_s26, %s405_s27  }
   0x9   :  { %397 = dma.done.wait [#allocation3], 1024  }
   0xa   :  { %398 = vsyncadd [#allocation3], 4294966272 }
   0xb   :  { %399 = dma.done.wait [#allocation6], 1024  }
   0xc   :  { %400 = vsyncadd [#allocation6], 4294966272  ;;  %v309_v0 = vld [vmem:[#allocation2 + $0x38] sm:$0xff]  ;;  %v308_v1 = vld [vmem:[#allocation2 + $0x30] sm:$0xff]  ;;  %s227_s12 = sshll.u32 %s461_s5, 4  ;;  %s228_s12 = int_to_ptr.hbm [resolvable:$true] %s227_s12 }
   0xd   :  { %123 = vmatpush.bf16.msra.mxu0 %v309_v0  ;;  %v317_v2 = vld [vmem:[#allocation5 + $0x38] sm:$0xff]  ;;  %v316_v3 = vld [vmem:[#allocation5 + $0x30] sm:$0xff]  ;;  %v307_v4 = vld [vmem:[#allocation2 + $0x28] sm:$0xff] }
   0xe   :  { %206 = vmatpush.bf16.msra.mxu1 %v317_v2  ;;  %v315_v5 = vld [vmem:[#allocation5 + $0x28] sm:$0xff]  ;;  %v306_v6 = vld [vmem:[#allocation2 + $0x20] sm:$0xff]  ;;  %v305_v8 = vld [vmem:[#allocation2 + $0x18] sm:$0xff] }
   0xf   :  { %v314_v7 = vld [vmem:[#allocation5 + $0x20] sm:$0xff]  ;;  %v313_v9 = vld [vmem:[#allocation5 + $0x18] sm:$0xff]  ;;  %v304_v10 = vld [vmem:[#allocation2 + $0x10] sm:$0xff] }
  0x10   :  { %v312_v11 = vld [vmem:[#allocation5 + $0x10] sm:$0xff]  ;;  %v303_v12 = vld [vmem:[#allocation2 + $0x8] sm:$0xff]  ;;  %v302_v13 = vld [vmem:[#allocation2] sm:$0xff] }
  0x11   :  { %124 = vmatpush.bf16.msra.mxu0 %v308_v1  ;;  %v53_v14 = vld [vmem:[%s456_s0] sm:$0xff]  ;;  %v311_v16 = vld [vmem:[#allocation5 + $0x8] sm:$0xff]  ;;  %s407_s0 = smov [#allocation7]  }
  0x12   :  { %207 = vmatpush.bf16.msra.mxu1 %v316_v3  ;;  %v54_v15 = vpack.c.bf16 %v53_v14, %v53_v14  ;;  %v310_v17 = vld [vmem:[#allocation5] sm:$0xff]  ;;  %s225_s9 = sshll.u32 %s407_s0, 4  ;;  %s226_s9 = int_to_ptr.vmem [resolvable:$true] %s225_s9 }
  0x13   :  { %v323_v18 = vld [vmem:[%s458_s2] ss:$0 sm:$0xff] }
  0x14   :  { %v324_v24 = vld [vmem:[%s460_s4] ss:$0 sm:$0xff] }
  0x15   :  { %125 = vmatpush.bf16.msra.mxu0 %v307_v4 }
  0x16   :  { %208 = vmatpush.bf16.msra.mxu1 %v315_v5 }
  0x19   :  { %126 = vmatpush.bf16.msra.mxu0 %v306_v6 }
  0x1a   :  { %209 = vmatpush.bf16.msra.mxu1 %v314_v7 }
  0x1d   :  { %127 = vmatpush.bf16.msra.mxu0 %v305_v8 }
  0x1e   :  { %210 = vmatpush.bf16.msra.mxu1 %v313_v9 }
  0x21   :  { %128 = vmatpush.bf16.msra.mxu0 %v304_v10 }
  0x22   :  { %211 = vmatpush.bf16.msra.mxu1 %v312_v11 }
  0x25   :  { %129 = vmatpush.bf16.msra.mxu0 %v303_v12 }
  0x26   :  { %212 = vmatpush.bf16.msra.mxu1 %v311_v16 }
  0x29   :  { %130 = vmatpush.bf16.msra.mxu0 %v302_v13 }
  0x2a   :  { %213 = vmatpush.bf16.msra.mxu1 %v310_v17 }
  0x2c   :  { %131 = vmatmul.bf16.vlgmr.msra.gmra.mxu0 %v54_v15 }
  0xa9   :  { %v132_v19 = vpop.f32.mrf.mxu0 }
  0xaa   :  { %v133_v20 = vadd.f32 %v323_v18, %v132_v19 }
  0xac   :  { %v136_v21 = vmax.f32 %v133_v20, 0.0 }
  0xae   :  { %v137_v22 = vpack.c.bf16 %v136_v21, %v136_v21 }
  0xb0   :  { %214 = vmatmul.bf16.vlgmr.msra.gmra.mxu1 %v137_v22 }
  0xb1   :  { %v134_v23 = vpop.f32.mrf.mxu0 }
 0x12d   :  { %v215_v25 = vpop.f32.mrf.mxu1 }
 0x12e   :  { %v216_v26 = vadd.f32 %v324_v24, %v215_v25 }
 0x130   :  { %219 = vst [vmem:[#allocation7] sm:$0xff] %v216_v26 }
 0x131   :  { %230 = dma.vmem_to_hbm [thread:$0]  %s226_s9, 128, %s228_s12, [#allocation4]  }
 0x135   :  { %v217_v27 = vpop.f32.mrf.mxu1 }
 0x136   :  { %401 = dma.done.wait [#allocation4], 128  }
 0x137   :  { %402 = vsyncadd [#allocation4], 4294967168 }
 0x138   :  { %235 = vsyncpa [#allocation3], 1 }
 0x139   :  { %236 = vsyncpa [#allocation6], 1 }
 0x13a   :  { %237 = vsyncpa [#allocation4], 1 }

</bundles_post_ra>
